<compile_context>
chip_gen: v6e
topology: v6e:2x2x1
jax: 0.10.0
libtpu: 0.0.40
codegen_flags: <defaults>
</compile_context>

<pallas_src>
import functools

import jax
import jax.numpy as jnp
from jax import lax
from jax.experimental import pallas as pl
from jax.experimental.pallas import tpu as pltpu

_LANES = 128
_SUB_ROWS = 64  # inner-reduction slice; multiple of 32 -> legal for f32/bf16/int8


def _sublane_multiple(dtype) -> int:
    """Min second-minor tile multiple for a dtype: f32->8, bf16->16, int8/bool->32."""
    itemsize = jnp.dtype(dtype).itemsize
    return max(8, 32 // max(1, itemsize))


def _bce_sum(x, y, label_smoothing):
    """Sum of numerically-stable BCE-with-logits on smoothed targets (f32)."""
    x = x.astype(jnp.float32)
    y = y.astype(jnp.float32)
    t = y * (1.0 - label_smoothing) + 0.5 * label_smoothing
    per = jnp.maximum(x, 0.0) - x * t + jnp.log1p(jnp.exp(-jnp.abs(x)))
    return jnp.sum(per)


def _logloss_kernel(x_ref, y_ref, out_ref, *, label_smoothing, sub_rows, n_sub):
    """One (tile_rows, 128) tile of BCE-with-logits, folded into an (8,128) block.

    out_ref is an (8,128) f32 partial-sum block, one per "parallel" chunk; it
    stays resident across the reduction (i) grid axis.
    """
    i = pl.program_id(1)

    @pl.when(i == 0)
    def _():
        out_ref[...] = jnp.zeros_like(out_ref)

    one_minus_s = 1.0 - label_smoothing
    half_s = 0.5 * label_smoothing

    def body(k, acc):
        # Read a (sub_rows, 128) slice of the tile: bounds the live-vreg range
        # so large tiles don't spill the 64-vreg file.
        r = pl.multiple_of(k * sub_rows, sub_rows)
        x = x_ref[pl.ds(r, sub_rows), :].astype(jnp.float32)
        y = y_ref[pl.ds(r, sub_rows), :].astype(jnp.float32)
        t = y * one_minus_s + half_s
        # Stable BCE-with-logits (matches PyTorch):
        #   max(x,0) - x*t + log1p(exp(-|x|))
        per = jnp.maximum(x, 0.0) - x * t + jnp.log1p(jnp.exp(-jnp.abs(x)))
        # Fold (sub_rows,128) -> (8,128) with plain VALU adds (no XLU reduce).
        return acc + jnp.sum(per.reshape(sub_rows // 8, 8, _LANES), axis=0)

    acc = lax.fori_loop(0, n_sub, body,
                        jnp.zeros((8, _LANES), jnp.float32), unroll=True)
    out_ref[...] += acc


def log_loss(sentence_features, labels, label_smoothing=0.0, *,
             tile_rows=2048, num_chunks=2):
    """Pallas implementation of LogLoss.forward.

    Args:
      sentence_features: (batch,) logits, any float dtype (f32/bf16/...).
      labels: (batch,) binary labels, any numeric dtype (kept narrow end-to-end).
      label_smoothing: python float.
      tile_rows: rows (of 128 lanes) per grid step.  2048 f32 ~= 1 MiB/input per
        step; raise to 4096-8192 on v7x if chasing the last % (VMEM budget is
        derived from the tile and passed explicitly).
      num_chunks: independent "parallel" chunks (2 covers v7x's two TCs).

    Returns:
      scalar float32 loss = mean BCE-with-logits on smoothed targets.
    """
    batch = sentence_features.shape[0]
    x = sentence_features
    y = labels
    ls = float(label_smoothing)

    # ---- static tiling math (no padding, no wrapper-side data copies) -------
    sub = max(_sublane_multiple(x.dtype), _sublane_multiple(y.dtype))
    rows_total = batch // _LANES
    quantum = _SUB_ROWS if rows_total >= _SUB_ROWS else sub
    n_quanta = rows_total // quantum

    if n_quanta == 0:
        # Batch smaller than one hardware tile: plain jnp reduction.
        return _bce_sum(x, y, ls) / batch

    n_chunks = num_chunks if n_quanta >= max(1, num_chunks) else 1
    n_chunks = max(1, n_chunks)
    tile_quanta = max(1, min(max(1, tile_rows) // quantum, n_quanta // n_chunks))
    tiles_per_chunk = (n_quanta // n_chunks) // tile_quanta
    tile_rows_eff = tile_quanta * quantum
    kernel_rows = n_chunks * tiles_per_chunk * tile_rows_eff
    kernel_elems = kernel_rows * _LANES

    sub_rows = min(_SUB_ROWS, tile_rows_eff)
    n_sub = tile_rows_eff // sub_rows

    # Lane-dense (rows, 128) packing of the tile-aligned prefix (free reshape).
    x2 = x[:kernel_elems].reshape(kernel_rows, _LANES)
    y2 = y[:kernel_elems].reshape(kernel_rows, _LANES)

    kernel = functools.partial(
        _logloss_kernel, label_smoothing=ls, sub_rows=sub_rows, n_sub=n_sub)

    in_block = pl.BlockSpec((tile_rows_eff, _LANES),
                            lambda c, i: (c * tiles_per_chunk + i, 0))

    x_bytes = jnp.dtype(x.dtype).itemsize
    y_bytes = jnp.dtype(y.dtype).itemsize
    tile_bytes = tile_rows_eff * _LANES * (x_bytes + y_bytes)
    # 2 inputs x double-buffered + output block + headroom; explicit so the
    # scoped-VMEM defaults (16 MiB v5e / 32 MiB v7x) never bite.
    vmem_limit = int(min(max(4 * tile_bytes + (2 << 20), 8 << 20), 48 << 20))

    cost = pl.CostEstimate(
        flops=10 * kernel_elems,
        transcendentals=2 * kernel_elems,
        bytes_accessed=kernel_elems * (x_bytes + y_bytes)
                       + n_chunks * 8 * _LANES * 4)

    partials = pl.pallas_call(
        kernel,
        out_shape=jax.ShapeDtypeStruct((n_chunks * 8, _LANES), jnp.float32),
        grid_spec=pltpu.PrefetchScalarGridSpec(
            num_scalar_prefetch=0,
            grid=(n_chunks, tiles_per_chunk),
            in_specs=[in_block, in_block],
            out_specs=pl.BlockSpec((8, _LANES), lambda c, i: (c, 0)),
        ),
        compiler_params=pltpu.CompilerParams(
            dimension_semantics=("parallel", "arbitrary"),
            vmem_limit_bytes=vmem_limit),
        cost_estimate=cost,
    )(x2, y2)

    total = jnp.sum(partials)
    if kernel_elems < batch:
        # <one-tile ragged remainder: tiny jnp epilogue instead of padding the
        # whole array (avoids a full HBM copy from jnp.pad).
        total = total + _bce_sum(x[kernel_elems:], y[kernel_elems:], ls)
    return total / batch


def _reference_log_loss(sentence_features, labels, label_smoothing=0.0):
    return _bce_sum(sentence_features, labels, label_smoothing) / sentence_features.shape[0]


if __name__ == "__main__":
    key = jax.random.PRNGKey(0)

    def run_case(batch, label_smoothing, tile_rows, x_dtype, y_dtype, case_id):
        k1, k2 = jax.random.split(jax.random.fold_in(key, case_id))
        logits = (jax.random.normal(k1, (batch,), dtype=jnp.float32) * 2.0
                  ).astype(x_dtype)
        labels = jax.random.bernoulli(k2, 0.5, (batch,)).astype(y_dtype)

        loss = jax.block_until_ready(
            log_loss(logits, labels, label_smoothing=label_smoothing,
                     tile_rows=tile_rows))
        ref = _reference_log_loss(logits, labels, label_smoothing)
        assert jnp.allclose(loss, ref, atol=2e-5, rtol=2e-5), (
            batch, float(loss), float(ref))

    # Kernel path at the minimum f32 tile, 2-way "parallel" chunk split.
    run_case(batch=2048, label_smoothing=0.1, tile_rows=2048,
             x_dtype=jnp.float32, y_dtype=jnp.float32, case_id=1)
    # Tiny batch: sub-tile jnp fallback path.
    run_case(batch=300, label_smoothing=0.0, tile_rows=2048,
             x_dtype=jnp.float32, y_dtype=jnp.float32, case_id=2)
    # Ragged batch: tile-aligned prefix in the kernel + small jnp tail (no pad).
    run_case(batch=8292, label_smoothing=0.05, tile_rows=2048,
             x_dtype=jnp.float32, y_dtype=jnp.float32, case_id=3)
    # Narrow native dtypes (bf16 logits + bf16 labels), dtype-aware 16-row tile.
    run_case(batch=4096, label_smoothing=0.2, tile_rows=2048,
             x_dtype=jnp.bfloat16, y_dtype=jnp.bfloat16, case_id=4)

    print("KERNEL_OK")
</pallas_src>

<mosaic_0001>
module attributes {stable_mosaic.version = 11 : i64} {
  func.func @_logloss_kernel(%arg0: i32, %arg1: i32, %arg2: memref<8x128xf32, #tpu.memory_space<vmem>>, %arg3: memref<8x128xf32, #tpu.memory_space<vmem>>, %arg4: memref<8x128xf32, #tpu.memory_space<vmem>>) attributes {dimension_semantics = [#tpu.dimension_semantics<parallel>, #tpu.dimension_semantics<arbitrary>], iteration_bounds = array<i64: 2, 1>, scalar_prefetch = 0 : i64, scratch_operands = 0 : i64, tpu.core_type = #tpu.core_type<tc>, window_params = [{transform_indices = @transform_0, window_bounds = array<i64: 8, 128>}, {transform_indices = @transform_1, window_bounds = array<i64: 8, 128>}, {transform_indices = @transform_2, window_bounds = array<i64: 8, 128>}]} {
    %c0_i32 = arith.constant 0 : i32
    %0 = arith.cmpi eq, %arg1, %c0_i32 : i32
    %1 = arith.extui %0 : i1 to i32
    %c0_i32_0 = arith.constant 0 : i32
    %2 = arith.cmpi ne, %1, %c0_i32_0 : i32
    scf.if %2 {
      %cst_12 = arith.constant 0.000000e+00 : f32
      %30 = vector.broadcast %cst_12 : f32 to vector<8x128xf32>
      %c0_13 = arith.constant 0 : index
      %c0_14 = arith.constant 0 : index
      %31 = vector.load %arg4[%c0_13, %c0_14] : memref<8x128xf32, #tpu.memory_space<vmem>>, vector<8x128xf32>
      tpu.vector_store %arg4[%c0_13, %c0_14], %30 {strides = array<i32>} : memref<8x128xf32, #tpu.memory_space<vmem>>, vector<8x128xf32>,
    } else {
    }
    %cst = arith.constant 0.000000e+00 : f32
    %3 = vector.broadcast %cst : f32 to vector<8x128xf32>
    %c0_i32_1 = arith.constant 0 : i32
    %c8_i32 = arith.constant 8 : i32
    %4 = arith.muli %c0_i32_1, %c8_i32 : i32
    %5 = tpu.assume_multiple %4, 8 : i32
    %6 = arith.index_cast %5 : i32 to index
    %c0 = arith.constant 0 : index
    %7 = vector.load %arg2[%6, %c0] : memref<8x128xf32, #tpu.memory_space<vmem>>, vector<8x128xf32>
    %8 = arith.index_cast %5 : i32 to index
    %c0_2 = arith.constant 0 : index
    %9 = vector.load %arg3[%8, %c0_2] : memref<8x128xf32, #tpu.memory_space<vmem>>, vector<8x128xf32>
    %cst_3 = arith.constant 0.899999976 : f32
    %10 = vector.broadcast %cst_3 : f32 to vector<8x128xf32>
    %11 = arith.mulf %9, %10 : vector<8x128xf32>
    %cst_4 = arith.constant 5.000000e-02 : f32
    %12 = vector.broadcast %cst_4 : f32 to vector<8x128xf32>
    %13 = arith.addf %11, %12 : vector<8x128xf32>
    %cst_5 = arith.constant 0.000000e+00 : f32
    %14 = vector.broadcast %cst_5 : f32 to vector<8x128xf32>
    %15 = arith.maximumf %7, %14 : vector<8x128xf32>
    %16 = arith.mulf %7, %13 : vector<8x128xf32>
    %17 = arith.subf %15, %16 : vector<8x128xf32>
    %18 = math.absf %7 : vector<8x128xf32>
    %cst_6 = arith.constant 0.000000e+00 : f32
    %19 = vector.broadcast %cst_6 : f32 to vector<8x128xf32>
    %20 = arith.subf %19, %18 : vector<8x128xf32>
    %21 = math.exp %20 : vector<8x128xf32>
    %22 = math.log1p %21 : vector<8x128xf32>
    %23 = arith.addf %17, %22 : vector<8x128xf32>
    %24 = vector.shape_cast %23 : vector<8x128xf32> to vector<1x8x128xf32>
    %cst_7 = arith.constant dense<0.000000e+00> : vector<8x128xf32>
    %25 = vector.multi_reduction <add>, %24, %cst_7 [0] : vector<1x8x128xf32> to vector<8x128xf32>
    %26 = arith.addf %3, %25 : vector<8x128xf32>
    %c1_i32 = arith.constant 1 : i32
    %c0_8 = arith.constant 0 : index
    %c0_9 = arith.constant 0 : index
    %27 = vector.load %arg4[%c0_8, %c0_9] : memref<8x128xf32, #tpu.memory_space<vmem>>, vector<8x128xf32>
    %28 = arith.addf %27, %26 : vector<8x128xf32>
    %c0_10 = arith.constant 0 : index
    %c0_11 = arith.constant 0 : index
    %29 = vector.load %arg4[%c0_10, %c0_11] : memref<8x128xf32, #tpu.memory_space<vmem>>, vector<8x128xf32>
    tpu.vector_store %arg4[%c0_10, %c0_11], %28 {strides = array<i32>} : memref<8x128xf32, #tpu.memory_space<vmem>>, vector<8x128xf32>,
    return
  }
  func.func @transform_0(%arg0: i32, %arg1: i32) -> (i32, i32) {
    %c1_i32 = arith.constant 1 : i32
    %0 = arith.muli %arg0, %c1_i32 : i32
    %1 = arith.addi %0, %arg1 : i32
    %c0_i32 = arith.constant 0 : i32
    %c0_i32_0 = arith.constant 0 : i32
    return %1, %c0_i32 : i32, i32
  }
  func.func @transform_1(%arg0: i32, %arg1: i32) -> (i32, i32) {
    %c1_i32 = arith.constant 1 : i32
    %0 = arith.muli %arg0, %c1_i32 : i32
    %1 = arith.addi %0, %arg1 : i32
    %c0_i32 = arith.constant 0 : i32
    %c0_i32_0 = arith.constant 0 : i32
    return %1, %c0_i32 : i32, i32
  }
  func.func @transform_2(%arg0: i32, %arg1: i32) -> (i32, i32) {
    %c0_i32 = arith.constant 0 : i32
    %c0_i32_0 = arith.constant 0 : i32
    return %arg0, %c0_i32 : i32, i32
  }
}

</mosaic_0001>

<bundles_post_ra>
// kernel: tpu_custom_call.1
= control target key start
LH: loop header
LB: loop body
LE: loop exit
PB: predicated region body
PF: predicated region fallthrough
CT: control target
= control target key end

     0   :  { %7 = vsyncpa [#allocation3], 0  ;;  %s778_s0 = inlined_call_operand.hbm [shape: f32[16,128], index: 0, kind: input, shape index: {}]   ;;  %s779_s1 = inlined_call_operand.hbm [shape: f32[16,128], index: 1, kind: input, shape index: {}]   ;;  %s780_s2 = inlined_call_operand.hbm [shape: f32[16,128], index: 2, kind: output, shape index: {}]  }
   0x1   :  { %9 = vsyncpa [#allocation3 + $0x1], 0 }
   0x2   :  { %10 = vsyncpa [#allocation6], 0 }
   0x3   :  { %12 = vsyncpa [#allocation6 + $0x1], 0 }
   0x4   :  { %13 = vsyncpa [#allocation4], 0 }
   0x5   :  { %15 = vsyncpa [#allocation4 + $0x1], 0  ;;  %s612_s9 = smov 0   ;;  %s614_s10 = smov 0  }
   0x6   :  { %s616_s11 = smov 0   ;;  %s618_s12 = smov 0  }
   0x7   :  { %s620_s13 = smov 0   ;;  %s622_s14 = smov 0  }
   0x8 LB: > { %s364_s15 = sadd.s32 4294967295, %s592_s14   ;;  %s365_s16 = sadd.s32 4294967294, %s592_s14   ;;  %s592_s14 = sphi %s622_s14, %s21_s14   ;;  %s588_s13 = sphi %s620_s13, %s792_s13   ;;  %s584_s12 = sphi %s618_s12, %s791_s12   ;;  %s580_s11 = sphi %s616_s11, %s790_s11   ;;  %s576_s10 = sphi %s614_s10, %s789_s10   ;;  %s572_s9 = sphi %s612_s9, %s788_s9  }
   0x9   : > { %s33_s17 = sadd.s32 1, %s588_s13  ;;  %s42_s18 = sadd.s32 1, %s580_s11 }
   0xa   : > { %p35_p0 = scmp.ge.s32.totalorder %s33_s17, 2  ;;  %p49_p1 = scmp.ne.s32.totalorder %s580_s11, %s576_s10 }
   0xb   : > { %p50_p2 = scmp.eq.s32.totalorder %s592_s14, 0  ;;  %p55_p3 = scmp.ne.s32.totalorder %s576_s10, %s572_s9 }
   0xc   : > { %s794_s17 = smov (%p35_p0, %s33_s17), 0  ;;  %p56_p5 = scmp.eq.s32.totalorder %s364_s15, 0 }
   0xd   : > { %p653_p4 = por %p50_p2, %p49_p1  ;;  %s39_s20 = ssub.s32 %s588_s13, %s794_s17 }
   0xe   : > { %p107_p6 = scmp.eq.s32.totalorder %s364_s15, 1  ;;  %p40_p7 = scmp.eq.s32.totalorder %s39_s20, 0 }
   0xf   : > { %p659_p8 = por %p56_p5, %p55_p3  ;;  %p113_p10 = scmp.eq.s32.totalorder %s365_s16, 1 }
  0x10   : > { %p663_p9 = por %p107_p6, %p49_p1  ;;  %p397_p13 = scmp.lt.s32.totalorder %s592_s14, 2 }
  0x11   : > { %s668_s23 = scalar_select %p40_p7, %s580_s11, %s42_s18  }
  0x12   : > { %p670_p11 = por %p113_p10, %p55_p3  ;;  %s677_s25 = sand.u32 1, %s580_s11  }
  0x13   : > { %s368_s26 = sshll.u32 %s677_s25, 3  ;;  %s369_s27 = sshll.u32 %s588_s13, 7 }
  0x14   : > { %s143_s30 = scalar_lea.hbm %s778_s0, %s369_s27  ;;  %s137_s3 = scalar_lea.vmem [#allocation2], %s368_s26 }
  0x15   : > { %s145_s4 = sshll.u32 %s137_s3, 4  ;;  %p686_p0 = pnand %p397_p13, %p653_p4  ;;  %s146_s4 = int_to_ptr.vmem [resolvable:$true] %s145_s4 }
  0x16   : > { %p372_p1 = scmp.ge.s32.totalorder %s592_s14, 1  ;;  %p169_p2 = scmp.lt.s32.totalorder %s592_s14, 3 }
  0x17   : > { %s134_s6 = scalar_lea.sflag [#allocation3], %s677_s25  ;;  %p454_p3 = pneg %p686_p0 }
  0x18   : > { %s465_s7 = scalar_lea.vmem %s146_s4, 128  ;;  %s594_s8 = smov [#allocation2]  }
  0x19   : > { %p466_p5 = scmp.ne.s32.totalorder %s146_s4, %s465_s7  ;;  %s470_s15 = sshll.u32 %s594_s8, 4  ;;  %s471_s15 = int_to_ptr.vmem [resolvable:$false] %s470_s15 }
  0x1a   : > { %s472_s16 = scalar_lea.vmem %s471_s15, 256  ;;  %p473_p4 = scmp.lt.s32.totalorder %s146_s4, %s471_s15 }
  0x1b   : > { %p468_p6 = pnand %p466_p5, %p454_p3  ;;  %p474_p10 = scmp.lt.s32.totalorder %s472_s16, %s465_s7 }
  0x1d   : > { %p469_p7 = pneg %p468_p6  ;;  %p475_p13 = por %p474_p10, %p473_p4 }
  0x1f   : > { %p476_p12 = pnand %p475_p13, %p469_p7 }
  0x21   : > { %479 = shalt.err (!%p476_p12)
}
  0x22   : > { %389 = dma.hbm_to_vmem [thread:$0]  (!%p686_p0), %s143_s30, 128, %s146_s4, %s134_s6  }
  0x23   : > { %p704_p5 = pnand %p372_p1, %p169_p2  ;;  %s162_s28 = scalar_lea.hbm %s779_s1, %s369_s27 }
  0x24   : > { %s156_s29 = scalar_lea.vmem [#allocation5], %s368_s26  ;;  %s153_s7 = scalar_lea.sflag [#allocation6], %s677_s25 }
  0x25   : > { %s164_s3 = sshll.u32 %s156_s29, 4  ;;  %s595_s30 = smov [#allocation5]   ;;  %s165_s3 = int_to_ptr.vmem [resolvable:$true] %s164_s3 }
  0x26   : > { %s493_s8 = scalar_lea.vmem %s165_s3, 128  ;;  %s498_s4 = sshll.u32 %s595_s30, 4  ;;  %s499_s4 = int_to_ptr.vmem [resolvable:$false] %s498_s4 }
  0x27   : > { %p494_p12 = scmp.ne.s32.totalorder %s165_s3, %s493_s8  ;;  %s500_s6 = scalar_lea.vmem %s499_s4, 256 }
  0x28   : > { %p501_p1 = scmp.lt.s32.totalorder %s165_s3, %s499_s4  ;;  %p502_p2 = scmp.lt.s32.totalorder %s500_s6, %s493_s8 }
  0x29   : > { %p496_p6 = pnand %p494_p12, %p454_p3 }
  0x2a   : > { %p503_p4 = por %p502_p2, %p501_p1 }
  0x2b   : > { %p497_p7 = pneg %p496_p6 }
  0x2d   : > { %p504_p10 = pnand %p503_p4, %p497_p7 }
  0x2f   : > { %507 = shalt.err (!%p504_p10)
}
  0x30   : > { %392 = dma.hbm_to_vmem [thread:$0]  (!%p686_p0), %s162_s28, 128, %s165_s3, %s153_s7  }
  0x31   : > { %173 = sbr.rel (%p704_p5) target bundleno = 112 (0x70), region = 28  ;;  %s720_s25 = sand.u32 (!%p704_p5), 1, %s576_s10  }
  0x32   : > { %s723_s26 = sshll.u32 (!%p704_p5), %s720_s25, 3  ;;  %s176_s27 = scalar_lea.sflag (!%p704_p5), [#allocation3], %s720_s25 }
  0x33   : > { %s179_s15 = scalar_lea.vmem (!%p704_p5), [#allocation2], %s723_s26 }
  0x36   : > { %559 = dma.done.wait (%p659_p8), %s176_s27, 128  }
  0x37   : > { %561 = vsyncadd (%p659_p8), %s176_s27, 4294967168  ;;  %s185_s5 = scalar_lea.sflag [#allocation6], %s720_s25  ;;  %s188_s16 = scalar_lea.vmem [#allocation5], %s723_s26 }
  0x38   : > { %563 = dma.done.wait (%p659_p8), %s185_s5, 128  }
  0x39   : > { %565 = vsyncadd (%p659_p8), %s185_s5, 4294967168  ;;  %v221_v0 = vld [vmem:[%s179_s15] sm:$0xff]  ;;  %v222_v5 = vld [vmem:[%s188_s16] sm:$0xff]  ;;  %s377_s21 = sshll.u32 %s584_s12, 7  ;;  %s213_s18 = scalar_lea.vmem [#allocation7], %s723_s26 }
  0x3a   : > { %v228_v1 = vand.u32 2147483647, %v221_v0  ;;  %v223_v7 = vmul.f32 0.9, %v222_v5  ;;  %v225_v11 = vmax.f32 %v221_v0, 0.0  ;;  %s261_s19 = sshll.u32 %s213_s18, 4  ;;  %s259_s29 = scalar_lea.hbm %s780_s2, %s377_s21  ;;  %s262_s19 = int_to_ptr.vmem [resolvable:$true] %s261_s19 }
  0x3b   : > { %s248_s3 = scalar_lea.sflag [#allocation4], %s720_s25  ;;  %s508_s7 = scalar_lea.vmem %s262_s19, 128 }
  0x3c   : > { %v229_v2 = vsub.f32 0.0, %v228_v1  ;;  %v224_v9 = vadd.f32 0.05, %v223_v7  ;;  %p509_p8 = scmp.ne.s32.totalorder %s262_s19, %s508_s7  ;;  %s596_s8 = smov [#allocation7]  }
  0x3d   : > { %s512_s30 = sshll.u32 %s596_s8, 4  ;;  %s513_s30 = int_to_ptr.vmem [resolvable:$false] %s512_s30 }
  0x3e   : > { %v230_v3 = vmul.f32 1.442695, %v229_v2  ;;  %v226_v12 = vmul.f32 %v224_v9, %v221_v0  ;;  %p510_p0 = pnand %p509_p8, %p663_p9  ;;  %s514_s4 = scalar_lea.vmem %s513_s30, 256 }
  0x3f   : > { %p515_p13 = scmp.lt.s32.totalorder %s262_s19, %s513_s30  ;;  %p516_p5 = scmp.lt.s32.totalorder %s514_s4, %s508_s7 }
  0x40   : > { %448 = vpow2.f32 %v230_v3  ;;  %v227_v16 = vsub.f32 %v225_v11, %v226_v12  ;;  %p511_p3 = pneg %p510_p0 }
  0x41   : > { %p517_p12 = por %p516_p5, %p515_p13 }
  0x43   : > { %p518_p6 = pnand %p517_p12, %p511_p3 }
  0x4d   : > { %v449_v4 = vpop.eup %448 }
  0x4e   : > { %v232_v6 = vadd.f32 1.0, %v449_v4  ;;  %v235_v8 = vmul.f32 -0.5, %v449_v4  ;;  %v238_v13 = vand.u32 2147483647, %v449_v4 }
  0x50   : > { %450 = vlog2.f32 %v232_v6  ;;  %v236_v10 = vadd.f32 1.0, %v235_v8  ;;  %vm239_vm0 = vcmp.lt.f32.partialorder %v238_v13, 0.0004427343 }
  0x52   : > { %v237_v14 = vmul.f32 %v449_v4, %v236_v10 }
  0x5d   : > { %v451_v15 = vpop.eup %450 }
  0x5e   : > { %v234_v17 = vmul.f32 0.6931472, %v451_v15 }
  0x60   : > { %v240_v18 = vsel %vm239_vm0, %v237_v14, %v234_v17 }
  0x61   : > { %v241_v19 = vadd.f32 %v240_v18, %v227_v16 }
  0x63   : > { %246 = vst [vmem:[%s213_s18] sm:$0xff] %v241_v19 }
  0x64   : > { %521 = shalt.err (!%p518_p6)
}
  0x65   : > { %s522_s12 = scalar_lea.hbm %s259_s29, 128  ;;  %s526_s26 = scalar_lea.hbm %s780_s2, 256 }
  0x66   : > { %p523_p7 = scmp.ne.s32.totalorder %s259_s29, %s522_s12  ;;  %p527_p4 = scmp.lt.s32.totalorder %s259_s29, %s780_s2 }
  0x67   : > { %p528_p10 = scmp.lt.s32.totalorder %s526_s26, %s522_s12 }
  0x68   : > { %p524_p1 = pnand %p523_p7, %p663_p9 }
  0x69   : > { %p529_p8 = por %p528_p10, %p527_p4 }
  0x6a   : > { %p525_p2 = pneg %p524_p1 }
  0x6c   : > { %p530_p0 = pnand %p529_p8, %p525_p2 }
  0x6e   : > { %533 = shalt.err (!%p530_p0)
}
  0x6f   : > { %384 = dma.vmem_to_hbm [thread:$0]  (%p663_p9), %s262_s19, 128, %s259_s29, %s248_s3  }
  0x70 PF: > { %s273_s5 = sand.u32 1, %s572_s9   ;;  %p787_p3 = scmp.ge.s32.totalorder %s592_s14, 2 }
  0x71   : > { %s274_s16 = scalar_lea.sflag [#allocation4], %s273_s5 }
  0x72   : > { %p394_p13 = pnand %p787_p3, %p670_p11 }
  0x74   : > { %p395_p5 = pneg %p394_p13 }
  0x76   : > { %567 = dma.done.wait (%p395_p5), %s274_s16, 128  }
  0x77   : > { %569 = vsyncadd (%p395_p5), %s274_s16, 4294967168  ;;  %s21_s14 = sadd.s32 1, %s592_s14   ;;  %s788_s9 = smov %s576_s10 }
  0x78   : > { %p18_p12 = scmp.ge.s32.totalorder %s21_s14, 4   ;;  %s789_s10 = smov %s580_s11 }
  0x79   : > { %s790_s11 = smov %s668_s23  ;;  %s791_s12 = smov %s588_s13 }
  0x7a   : > { %s792_s13 = smov %s794_s17  ;;  %20 = sbr.rel (!%p18_p12) target bundleno = 8 (0x8), region = 90 }
  0x7f   :  { %279 = vsyncpa [#allocation3], 1 }
  0x80   :  { %281 = vsyncpa [#allocation3 + $0x1], 1 }
  0x81   :  { %282 = vsyncpa [#allocation6], 1 }
  0x82   :  { %284 = vsyncpa [#allocation6 + $0x1], 1 }
  0x83   :  { %285 = vsyncpa [#allocation4], 1 }
  0x84   :  { %287 = vsyncpa [#allocation4 + $0x1], 1 }

</bundles_post_ra>
